<compile_context>
chip_gen: v7x
topology: tpu7x:2x2x1
jax: 0.10.0
libtpu: 0.0.40
codegen_flags: <defaults>
</compile_context>

<pallas_src>
import jax
import jax.numpy as jnp
from jax.experimental import pallas as pl
from jax.experimental.pallas import tpu as pltpu

BN_EPS = 1e-5


# ----------------------------- Pallas kernel ------------------------------- #

def _bn_relu_pool_conv_kernel(x_ref, scale_ref, shift_ref, w_ref, o_ref):
    # x_ref:     (tm, 4*C)    bf16  im2col rows: 4 pooling taps (tap-major) x C channels
    # scale_ref: (1, 4*C)     f32   BN scale, tiled over the 4 taps
    # shift_ref: (1, 4*C)     f32   BN shift, tiled over the 4 taps
    # w_ref:     (C, Co_pad)  bf16  0.25 * conv weight (pool factor folded once)
    # o_ref:     (tm, Co_pad) f32
    c = w_ref.shape[0]
    act = jnp.maximum(
        x_ref[...].astype(jnp.float32) * scale_ref[...] + shift_ref[...], 0.0)
    # 2x2 average pool commuted ahead of the 1x1 conv: sum the 4 tap chunks (VPU adds),
    # then one MXU matmul over C instead of 4*C.
    pooled = (act[:, 0:c] + act[:, c:2 * c]
              + act[:, 2 * c:3 * c] + act[:, 3 * c:4 * c])
    o_ref[...] = jnp.dot(pooled.astype(jnp.bfloat16), w_ref[...],
                         preferred_element_type=jnp.float32)


def _round_up(x, m):
    return (x + m - 1) // m * m


def _fused_bn_relu_pool_conv(xw, scale4, shift4, w_pool, tm_target=512):
    """Row-tiled fused BN-affine + ReLU + 2x2 avg-pool + 1x1 conv."""
    rows, k = xw.shape                       # k = 4*C
    c, co = w_pool.shape

    # Lane-dense output: pad Co up to a multiple of 128 (sliced off after the kernel).
    co_pad = _round_up(co, 128)
    if co_pad != co:
        w_pool = jnp.pad(w_pool, ((0, 0), (0, co_pad - co)))

    # Per-grid-step VMEM footprint estimate (double-buffered x/out, weight, intermediates).
    def vmem_est(tm):
        return (2 * tm * k * 2            # x tile, bf16, double-buffered
                + 2 * tm * co_pad * 4     # out tile, f32, double-buffered
                + 2 * c * co_pad * 2      # weight, bf16 (conservatively x2)
                + 4 * k * 4               # scale + shift, f32
                + tm * k * 4              # act intermediate, f32
                + tm * c * 4)             # pooled intermediate, f32

    # Shrink the row-tile target if a very wide layer would blow the v7x VMEM budget.
    tm_cap = tm_target
    while tm_cap > 64 and vmem_est(tm_cap) > (40 << 20):
        tm_cap //= 2

    # Balanced tiling: minimal padding waste, >= 2 (even) grid steps for v7x megacore.
    grid = max(pl.cdiv(rows, tm_cap), 2 if rows > 16 else 1)
    if grid > 1 and grid % 2:
        grid += 1
    tm = _round_up(pl.cdiv(rows, grid), 16)   # 16: bf16 sublane packing
    rows_pad = tm * grid
    if rows_pad != rows:
        xw = jnp.pad(xw, ((0, rows_pad - rows), (0, 0)))

    cost = pl.CostEstimate(
        flops=2 * rows_pad * c * co_pad,
        transcendentals=0,
        bytes_accessed=(2 * rows_pad * k          # bf16 x
                        + 2 * c * co_pad          # bf16 weight
                        + 4 * rows_pad * co_pad   # f32 out
                        + 2 * 4 * k),             # f32 scale/shift
    )

    out = pl.pallas_call(
        _bn_relu_pool_conv_kernel,
        out_shape=jax.ShapeDtypeStruct((rows_pad, co_pad), jnp.float32),
        grid_spec=pltpu.PrefetchScalarGridSpec(
            num_scalar_prefetch=0,
            grid=(grid,),
            in_specs=[
                pl.BlockSpec((tm, k), lambda i: (i, 0)),
                pl.BlockSpec((1, k), lambda i: (0, 0)),
                pl.BlockSpec((1, k), lambda i: (0, 0)),
                pl.BlockSpec((c, co_pad), lambda i: (0, 0)),
            ],
            out_specs=pl.BlockSpec((tm, co_pad), lambda i: (i, 0)),
        ),
        compiler_params=pltpu.CompilerParams(
            dimension_semantics=("parallel",),
            vmem_limit_bytes=48 * 1024 * 1024,    # explicit; <= v7x 64 MiB physical
        ),
        cost_estimate=cost,
    )(xw, scale4, shift4, w_pool)
    return out[:rows, :co]


# ------------------------------- JAX wrapper -------------------------------- #

def init_transition_layer(key, in_ch, theta=0.5):
    out_ch = int(in_ch * theta)
    k1, k2, k3 = jax.random.split(key, 3)
    # w[c, o] corresponds to PyTorch conv.weight[o, c, 0, 0]
    w = jax.random.normal(k1, (in_ch, out_ch), jnp.float32) / jnp.sqrt(float(in_ch))
    gamma = 1.0 + 0.1 * jax.random.normal(k2, (in_ch,), jnp.float32)
    beta = 0.1 * jax.random.normal(k3, (in_ch,), jnp.float32)
    return dict(gamma=gamma, beta=beta, w=w)


def transition_layer_forward(x_nchw, params):
    gamma, beta, w = params["gamma"], params["beta"], params["w"]
    n, c, h, wdt = x_nchw.shape
    co = w.shape[1]
    hp, wp = h // 2, wdt // 2                # AvgPool2d(2,2) floor mode

    # Training-mode BatchNorm2d batch stats over the FULL input, one pass
    # (sum / sum-of-squares, biased variance).
    cnt = n * h * wdt
    s1 = jnp.sum(x_nchw, axis=(0, 2, 3))
    s2 = jnp.sum(jnp.square(x_nchw), axis=(0, 2, 3))
    mean = s1 / cnt
    var = jnp.maximum(s2 / cnt - jnp.square(mean), 0.0)
    scale = gamma / jnp.sqrt(var + BN_EPS)
    shift = beta - mean * scale

    # The pool only looks at the first 2*hp x 2*wp pixels -> crop before the fused kernel.
    x_crop = x_nchw[:, :, :2 * hp, :2 * wp]

    # bf16 im2col over the 2x2 pooling windows (one fused XLA convert+transpose; this IS
    # the NCHW -> channel-minor layout change we would need anyway):
    # (N, C, 2hp, 2wp) -> (N, hp, wp, dy, dx, C) -> (N*hp*wp, 4*C)
    xw = (
        x_crop.astype(jnp.bfloat16)
        .reshape(n, c, hp, 2, wp, 2)
        .transpose(0, 2, 4, 3, 5, 1)
        .reshape(n * hp * wp, 4 * c)
    )

    scale4 = jnp.tile(scale, 4).reshape(1, 4 * c).astype(jnp.float32)
    shift4 = jnp.tile(shift, 4).reshape(1, 4 * c).astype(jnp.float32)
    w_pool = (0.25 * w).astype(jnp.bfloat16)         # (C, Co), 2x2-avg folded once

    out = _fused_bn_relu_pool_conv(xw, scale4, shift4, w_pool)   # (N*hp*wp, Co) f32
    return out.reshape(n, hp, wp, co).transpose(0, 3, 1, 2)      # -> NCHW


# ---------------------------- pure-JAX reference ---------------------------- #

def _ref_transition_layer(x_nchw, params):
    gamma, beta, w = params["gamma"], params["beta"], params["w"]
    x = jnp.transpose(x_nchw, (0, 2, 3, 1))
    mean = jnp.mean(x, axis=(0, 1, 2))
    var = jnp.mean(jnp.square(x - mean), axis=(0, 1, 2))
    t = jnp.maximum((x - mean) / jnp.sqrt(var + BN_EPS) * gamma + beta, 0.0)
    y = jnp.einsum("nhwc,cd->nhwd", t, w)
    n, h, wdt, co = y.shape
    hp, wp = h // 2, wdt // 2
    y = y[:, : 2 * hp, : 2 * wp, :].reshape(n, hp, 2, wp, 2, co).mean(axis=(2, 4))
    return jnp.transpose(y, (0, 3, 1, 2))


# ---------------------------------- main ------------------------------------ #

if __name__ == "__main__":
    key = jax.random.PRNGKey(0)
    fwd = jax.jit(transition_layer_forward)

    # bf16 activation/weight operands (f32 accumulation) slightly loosen accuracy vs. the
    # pure-f32 reference; 2e-2 tolerance is comfortably above the ~5e-3 worst-case error.
    RTOL = ATOL = 2e-2

    # Case 1: typical small shape (in_ch=64, theta=0.5 -> out_ch=32).
    k1, k2, key = jax.random.split(key, 3)
    x1 = jax.random.normal(k1, (2, 64, 16, 16), jnp.float32)     # NCHW, like PyTorch
    p1 = init_transition_layer(k2, 64, theta=0.5)
    out1 = jax.block_until_ready(fwd(x1, p1))
    assert out1.shape == (2, 32, 8, 8), out1.shape
    ref1 = jax.block_until_ready(_ref_transition_layer(x1, p1))
    err1 = float(jnp.max(jnp.abs(out1 - ref1)))
    assert jnp.allclose(out1, ref1, rtol=RTOL, atol=ATOL), err1

    # Case 2: odd spatial dims (floor-mode pooling crop), a row count that is not a
    # multiple of the tile (pad-to-tile path), and a lane-sparse out_ch=16 that gets
    # padded to 128 inside the wrapper and sliced after the kernel.
    k3, k4 = jax.random.split(key)
    x2 = jax.random.normal(k3, (1, 32, 17, 11), jnp.float32)
    p2 = init_transition_layer(k4, 32, theta=0.5)
    out2 = jax.block_until_ready(fwd(x2, p2))
    assert out2.shape == (1, 16, 8, 5), out2.shape
    ref2 = jax.block_until_ready(_ref_transition_layer(x2, p2))
    err2 = float(jnp.max(jnp.abs(out2 - ref2)))
    assert jnp.allclose(out2, ref2, rtol=RTOL, atol=ATOL), err2

    print("KERNEL_OK")
</pallas_src>

<mosaic_0001>
module attributes {stable_mosaic.version = 11 : i64} {
  func.func @_bn_relu_pool_conv_kernel(%arg0: i32, %arg1: memref<64x256xbf16, #tpu.memory_space<vmem>>, %arg2: memref<1x256xf32, #tpu.memory_space<vmem>>, %arg3: memref<1x256xf32, #tpu.memory_space<vmem>>, %arg4: memref<64x128xbf16, #tpu.memory_space<vmem>>, %arg5: memref<64x128xf32, #tpu.memory_space<vmem>>) attributes {dimension_semantics = [#tpu.dimension_semantics<parallel>], iteration_bounds = array<i64: 2>, scalar_prefetch = 0 : i64, scratch_operands = 0 : i64, tpu.core_type = #tpu.core_type<tc>, window_params = [{transform_indices = @transform_0, window_bounds = array<i64: 64, 256>}, {pipeline_mode = #tpu.pipeline_mode<synchronous>, transform_indices = @transform_1, window_bounds = array<i64: 1, 256>}, {pipeline_mode = #tpu.pipeline_mode<synchronous>, transform_indices = @transform_2, window_bounds = array<i64: 1, 256>}, {pipeline_mode = #tpu.pipeline_mode<synchronous>, transform_indices = @transform_3, window_bounds = array<i64: 64, 128>}, {transform_indices = @transform_4, window_bounds = array<i64: 64, 128>}]} {
    %c0 = arith.constant 0 : index
    %c0_0 = arith.constant 0 : index
    %0 = vector.load %arg1[%c0, %c0_0] : memref<64x256xbf16, #tpu.memory_space<vmem>>, vector<64x256xbf16>
    %1 = arith.extf %0 : vector<64x256xbf16> to vector<64x256xf32>
    %c0_1 = arith.constant 0 : index
    %c0_2 = arith.constant 0 : index
    %2 = vector.load %arg2[%c0_1, %c0_2] : memref<1x256xf32, #tpu.memory_space<vmem>>, vector<1x256xf32>
    %3 = vector.broadcast %2 : vector<1x256xf32> to vector<64x256xf32>
    %4 = arith.mulf %1, %3 : vector<64x256xf32>
    %c0_3 = arith.constant 0 : index
    %c0_4 = arith.constant 0 : index
    %5 = vector.load %arg3[%c0_3, %c0_4] : memref<1x256xf32, #tpu.memory_space<vmem>>, vector<1x256xf32>
    %6 = vector.broadcast %5 : vector<1x256xf32> to vector<64x256xf32>
    %7 = arith.addf %4, %6 : vector<64x256xf32>
    %cst = arith.constant 0.000000e+00 : f32
    %8 = vector.broadcast %cst : f32 to vector<64x256xf32>
    %9 = arith.maximumf %7, %8 : vector<64x256xf32>
    %10 = vector.extract_strided_slice %9 {offsets = [0, 0], sizes = [64, 64], strides = [1, 1]} : vector<64x256xf32> to vector<64x64xf32>
    %11 = vector.extract_strided_slice %9 {offsets = [0, 64], sizes = [64, 64], strides = [1, 1]} : vector<64x256xf32> to vector<64x64xf32>
    %12 = arith.addf %10, %11 : vector<64x64xf32>
    %13 = vector.extract_strided_slice %9 {offsets = [0, 128], sizes = [64, 64], strides = [1, 1]} : vector<64x256xf32> to vector<64x64xf32>
    %14 = arith.addf %12, %13 : vector<64x64xf32>
    %15 = vector.extract_strided_slice %9 {offsets = [0, 192], sizes = [64, 64], strides = [1, 1]} : vector<64x256xf32> to vector<64x64xf32>
    %16 = arith.addf %14, %15 : vector<64x64xf32>
    %17 = arith.truncf %16 : vector<64x64xf32> to vector<64x64xbf16>
    %c0_5 = arith.constant 0 : index
    %c0_6 = arith.constant 0 : index
    %18 = vector.load %arg4[%c0_5, %c0_6] : memref<64x128xbf16, #tpu.memory_space<vmem>>, vector<64x128xbf16>
    %cst_7 = arith.constant dense<0.000000e+00> : vector<64x128xf32>
    %19 = tpu.matmul %17, %18, %cst_7 {dimension_numbers = #tpu.dot_dimension_numbers<[1], [0], [0], [1], [0, 0, 1, 1], [], []>} : vector<64x64xbf16>, vector<64x128xbf16>, vector<64x128xf32> -> vector<64x128xf32>
    %c0_8 = arith.constant 0 : index
    %c0_9 = arith.constant 0 : index
    %20 = vector.load %arg5[%c0_8, %c0_9] : memref<64x128xf32, #tpu.memory_space<vmem>>, vector<64x128xf32>
    tpu.vector_store %arg5[%c0_8, %c0_9], %19 {strides = array<i32>} : memref<64x128xf32, #tpu.memory_space<vmem>>, vector<64x128xf32>,
    return
  }
  func.func @transform_0(%arg0: i32) -> (i32, i32) {
    %c0_i32 = arith.constant 0 : i32
    %c0_i32_0 = arith.constant 0 : i32
    return %arg0, %c0_i32 : i32, i32
  }
  func.func @transform_1(%arg0: i32) -> (i32, i32) {
    %c0_i32 = arith.constant 0 : i32
    %c0_i32_0 = arith.constant 0 : i32
    %c0_i32_1 = arith.constant 0 : i32
    return %c0_i32, %c0_i32_0 : i32, i32
  }
  func.func @transform_2(%arg0: i32) -> (i32, i32) {
    %c0_i32 = arith.constant 0 : i32
    %c0_i32_0 = arith.constant 0 : i32
    %c0_i32_1 = arith.constant 0 : i32
    return %c0_i32, %c0_i32_0 : i32, i32
  }
  func.func @transform_3(%arg0: i32) -> (i32, i32) {
    %c0_i32 = arith.constant 0 : i32
    %c0_i32_0 = arith.constant 0 : i32
    %c0_i32_1 = arith.constant 0 : i32
    return %c0_i32, %c0_i32_0 : i32, i32
  }
  func.func @transform_4(%arg0: i32) -> (i32, i32) {
    %c0_i32 = arith.constant 0 : i32
    %c0_i32_0 = arith.constant 0 : i32
    return %arg0, %c0_i32 : i32, i32
  }
}

</mosaic_0001>

<bundles_post_ra>
// kernel: tile.13
= control target key start
LH: loop header
LB: loop body
LE: loop exit
PB: predicated region body
PF: predicated region fallthrough
CT: control target
= control target key end

     0   :  { %s22_s0 = inlined_call_operand.vmem [shape: f32[64], index: 0, kind: input, shape index: {}]   ;;  %s23_s1 = inlined_call_operand.vmem [shape: f32[4,64], index: 1, kind: output, shape index: {}]  }
   0x1   :  { %v4_v0 = vld [vmem:[%s22_s0] ss:$0 sm:$0xff] }
   0x2   :  { %5 = vst [vmem:[%s23_s1] sm:$0xf] %v4_v0 }

// kernel: tile.14
= control target key start
LH: loop header
LB: loop body
LE: loop exit
PB: predicated region body
PF: predicated region fallthrough
CT: control target
= control target key end

     0   :  { %s6_s8 = smov 3  ;;  %vm8_vm0 = vcmask 523264   ;;  %s30_s9 = smov 64   ;;  %vm15_vm1 = vcmask 1048064   ;;  %s50_s0 = inlined_call_operand.vmem [shape: f32[4,64], index: 0, kind: input, shape index: {}]   ;;  %s51_s1 = inlined_call_operand.vmem [shape: f32[1,256], index: 1, kind: output, shape index: {}]  }
   0x1   :  { %v4_v0 = vld [vmem:[%s50_s0] sm:$0xf]  ;;  %s11_s0 = smov 3 }
   0x2   :  { %5 = vst [vmem:[#allocation1] sm:$0xf] %v4_v0 }
   0x9   :  { %v12_v1 = vld [vmem:[#allocation1 + $0x1] ss:$2 sm:%s11_s0]   ;;  %v7_v2 = vld [vmem:[#allocation1] ss:$2 sm:%s6_s8]  }
   0xa   :  { %13 = vrot.lane.b32.xlu0 %v12_v1, %s30_s9  ;;  %9 = vst.msk [vmem:[#allocation0] ss:$8 sm:$0x3] %vm8_vm0, %v7_v2  }
  0x7c   :  { %v14_v3 = vpop.permute.xlu0 %13  }
  0x7d   :  { %16 = vst.msk [vmem:[#allocation0] ss:$8 sm:$0x3] %vm15_vm1, %v14_v3  }
  0x84   :  { %v20_v4 = vld [vmem:[#allocation0] sm:$0x1]  ;;  %v24_v5 = vld [vmem:[#allocation0 + $0x8] sm:$0x1] }
  0x85   :  { %22 = vst [vmem:[%s51_s1] sm:$0x1] %v20_v4  ;;  %28 = vst [vmem:[%s51_s1 + $0x1] sm:$0x1] %v24_v5 }

// kernel: transition_layer_forward.1
= control target key start
LH: loop header
LB: loop body
LE: loop exit
PB: predicated region body
PF: predicated region fallthrough
CT: control target
= control target key end

     0   :  { %9 = vsyncpa [#allocation3], 0  ;;  %s1009_s0 = inlined_call_operand.vmem [shape: bf16[128,256], index: 0, kind: input, shape index: {}]   ;;  %s1010_s1 = inlined_call_operand.vmem [shape: f32[1,256], index: 1, kind: input, shape index: {}]   ;;  %s1011_s2 = inlined_call_operand.vmem [shape: f32[1,256], index: 2, kind: input, shape index: {}]   ;;  %s1012_s3 = inlined_call_operand.vmem [shape: bf16[64,128], index: 3, kind: input, shape index: {}]   ;;  %s1013_s4 = inlined_call_operand.hbm [shape: f32[128,128], index: 4, kind: output, shape index: {}]  }
   0x1   :  { %11 = vsyncpa [#allocation3 + $0x1], 0  ;;  %s779_s15 = smov 0   ;;  %s781_s16 = smov 0  }
   0x2   :  { %s783_s17 = smov 0   ;;  %s785_s18 = smov 0  }
   0x3 LB: > { %s800_s19 = sadd.s32 4294967295, %s748_s18   ;;  %s585_s20 = sadd.s32 4294967294, %s748_s18   ;;  %s748_s18 = sphi %s785_s18, %s1019_s18   ;;  %s744_s17 = sphi %s783_s17, %s1018_s17   ;;  %s740_s16 = sphi %s781_s16, %s1017_s16   ;;  %s736_s15 = sphi %s779_s15, %s1016_s15  }
   0x4   : > { %s804_s21 = sadd.s32 1, %s748_s18   ;;  %s113_s22 = sadd.s32 1, %s744_s17 }
   0x5   : > { %s110_s23 = ssub.s32 %s748_s18, %s804_s21  ;;  %p123_p0 = scmp.ne.s32.totalorder %s744_s17, %s740_s16 }
   0x6   : > { %p111_p1 = scmp.eq.s32.totalorder %s110_s23, 0  ;;  %p124_p2 = scmp.eq.s32.totalorder %s800_s19, 1 }
   0x7   : > { %p129_p3 = scmp.ne.s32.totalorder %s740_s16, %s736_s15  ;;  %p130_p4 = scmp.eq.s32.totalorder %s585_s20, 1 }
   0x8   : > { %s815_s24 = scalar_select %p111_p1, %s744_s17, %s113_s22  }
   0x9   : > { %p817_p5 = por %p124_p2, %p123_p0  ;;  %p821_p6 = por %p130_p4, %p129_p3 }
   0xa   : > { %p588_p7 = scmp.ge.s32.totalorder %s748_s18, 1  ;;  %p167_p8 = scmp.lt.s32.totalorder %s748_s18, 3 }
   0xc   : > { %p168_p9 = pnand %p588_p7, %p167_p8 }
   0xd   : > { %s590_s27 = sshll.u32 (!%p168_p9), %s800_s19, 3  ;;  %v229_v0 = vlaneseq (!%p168_p9)  ;;  %v227_v1 = vld [vmem:[%s1010_s1] sm:$0x3] (!%p168_p9)  ;;  %s750_s12 = smov (!%p168_p9), 64   ;;  %v683_v46 = vld [vmem:[%s1012_s3 + $0x8] sm:$0xff] (!%p168_p9)   ;;  %v684_v56 = vld [vmem:[%s1012_s3 + $0x10] sm:$0xff] (!%p168_p9)  }
   0xe   : > { %171 = sbr.rel (%p168_p9) target bundleno = 411 (0x19b), region = 36  ;;  %p195_p10 = scmp.lt.s32.totalorder (!%p168_p9), %s590_s27, 15  ;;  %v255_v4 = vld [vmem:[%s1011_s2] sm:$0x3] (!%p168_p9)  ;;  %vm423_vm0 = vcmask (!%p168_p9), 523264  }
   0xf   : > { %v230_v2 = vshrl.u32 (!%p168_p9), %v229_v0, 7  ;;  %v682_v34 = vld [vmem:[%s1012_s3] sm:$0xff] (!%p168_p9)   ;;  %s191_s28 = sand.u32 (!%p168_p9), 1, %s740_s16   ;;  %s607_s6 = sshll.u32 (!%p168_p9), %s800_s19, 10 }
  0x10   : > { %616 = vmatprep.subr.bf16.mxu0 (!%p168_p9), %v682_v34  ;;  %632 = vmatprep.subr.bf16.mxu1 (!%p168_p9), %v682_v34  ;;  %s589_s29 = sshll.u32 (!%p168_p9), %s191_s28, 6  ;;  %s968_s19 = scalar_lea.sflag (!%p168_p9), [#allocation3], %s191_s28 }
  0x11   : > { %v231_v3 = vsub.s32 (!%p168_p9), 0, %v230_v2  ;;  %v235_v21 = vsub.s32 (!%p168_p9), 1, %v230_v2  ;;  %617 = vmatpush3.bf16.msra.mxu0 (!%p168_p9), %v682_v34  ;;  %636 = vmatpush3.bf16.msra.mxu1 (!%p168_p9), %v682_v34  ;;  %s751_s11 = smov (!%p168_p9), [#allocation2]  }
  0x12   : > { %618 = vmatprep.subr.bf16.mxu0 (!%p168_p9), %v683_v46  ;;  %633 = vmatprep.subr.bf16.mxu1 (!%p168_p9), %v683_v46 }
  0x13   : > { %v232_v5 = vrot.slane (!%p168_p9), %v227_v1, %v231_v3  ;;  %v260_v10 = vrot.slane (!%p168_p9), %v255_v4, %v231_v3  ;;  %v866_v35 = vrot.slane (!%p168_p9), %v227_v1, %v235_v21  ;;  %v264_v47 = vrot.slane (!%p168_p9), %v255_v4, %v235_v21  ;;  %v685_v1 = vld [vmem:[%s1012_s3 + $0x18] sm:$0xff] (!%p168_p9)  }
  0x15   : > { %s1021_s27 = smov (!%p195_p10, %s590_s27), 15  ;;  %619 = vmatpush3.bf16.msra.mxu0 %v683_v46  ;;  %637 = vmatpush3.bf16.msra.mxu1 %v683_v46 }
  0x16   : > { %s606_s30 = sshll.u32 %s1021_s27, 3  ;;  %620 = vmatprep.subr.bf16.mxu0 %v684_v56  ;;  %634 = vmatprep.subr.bf16.mxu1 %v684_v56 }
  0x17   : > { %s199_s9 = scalar_lea.vmem %s1009_s0, %s606_s30  ;;  %s193_s30 = scalar_lea.vmem [#allocation2], %s589_s29 }
  0x18   : > { %v837_v6 = vld [vmem:[%s199_s9 + $0x20] sm:$0xff]  ;;  %v839_v8 = vld [vmem:[%s199_s9 + $0x28] sm:$0xff]  ;;  %v842_v13 = vld [vmem:[%s199_s9 + $0x18] sm:$0xff]  ;;  %s523_s5 = sshll.u32 %s193_s30, 4  ;;  %s961_s5 = int_to_ptr.vmem [resolvable:$true] %s523_s5 }
  0x19   : > { %v203_v7 = vld [vmem:[%s199_s9] sm:$0xff]  ;;  %v219_v9 = vunpack.c.l.bf16 %v837_v6  ;;  %v204_v12 = vld [vmem:[%s199_s9 + $0x8] sm:$0xff]  ;;  %v844_v14 = vld [vmem:[%s199_s9 + $0x10] sm:$0xff]  ;;  %v221_v15 = vunpack.c.l.bf16 %v839_v8  ;;  %v217_v17 = vunpack.c.l.bf16 %v842_v13  ;;  %v220_v48 = vunpack.c.h.bf16 %v837_v6  ;;  %621 = vmatpush3.bf16.msra.mxu0 %v684_v56  ;;  %638 = vmatpush3.bf16.msra.mxu1 %v684_v56  ;;  %s686_s10 = scalar_lea.vmem %s961_s5, 1024 }
  0x1a   : > { %v211_v11 = vunpack.c.l.bf16 %v203_v7  ;;  %v213_v16 = vunpack.c.l.bf16 %v204_v12  ;;  %v215_v18 = vunpack.c.l.bf16 %v844_v14  ;;  %v849_v19 = vld [vmem:[%s199_s9 + $0x38] sm:$0xff]  ;;  %v851_v20 = vld [vmem:[%s199_s9 + $0x30] sm:$0xff]  ;;  %v212_v38 = vunpack.c.h.bf16 %v203_v7  ;;  %622 = vmatprep.subr.bf16.mxu0 %v685_v1  ;;  %635 = vmatprep.subr.bf16.mxu1 %v685_v1  ;;  %s966_s9 = scalar_lea.hbm %s1013_s4, %s607_s6  ;;  %p687_p11 = scmp.ne.s32.totalorder %s961_s5, %s686_s10 }
  0x1b   : > { %v247_v22 = vmul.f32 %v232_v5, %v219_v9  ;;  %v225_v24 = vunpack.c.l.bf16 %v849_v19  ;;  %v249_v25 = vmul.f32 %v232_v5, %v221_v15  ;;  %v245_v27 = vmul.f32 %v232_v5, %v217_v17 }
  0x1c   : > { %v239_v23 = vmul.f32 %v232_v5, %v211_v11  ;;  %v241_v26 = vmul.f32 %v232_v5, %v213_v16  ;;  %v223_v28 = vunpack.c.l.bf16 %v851_v20  ;;  %v243_v31 = vmul.f32 %v232_v5, %v215_v18  ;;  %p688_p12 = pnand %p687_p11, %p817_p5 }
  0x1d   : > { %v855_v29 = vadd.f32 %v260_v10, %v247_v22  ;;  %v859_v32 = vadd.f32 %v260_v10, %v249_v25  ;;  %v870_v39 = vadd.f32 %v260_v10, %v245_v27  ;;  %v253_v40 = vmul.f32 %v232_v5, %v225_v24  ;;  %623 = vmatpush3.bf16.msra.mxu0 %v685_v1 }
  0x1e   : > { %v857_v30 = vadd.f32 %v260_v10, %v239_v23  ;;  %v861_v33 = vadd.f32 %v260_v10, %v241_v26  ;;  %v251_v41 = vmul.f32 %v232_v5, %v223_v28  ;;  %v880_v44 = vadd.f32 %v260_v10, %v243_v31  ;;  %639 = vmatpush3.bf16.msra.mxu1 %v685_v1  ;;  %p689_p13 = pneg %p688_p12 }
  0x1f   : > { %v291_v36 = vmax.f32 %v855_v29, 0.0  ;;  %v293_v42 = vmax.f32 %v859_v32, 0.0  ;;  %v214_v45 = vunpack.c.h.bf16 %v204_v12  ;;  %v289_v49 = vmax.f32 %v870_v39, 0.0 }
  0x20   : > { %v283_v37 = vmax.f32 %v857_v30, 0.0  ;;  %v285_v43 = vmax.f32 %v861_v33, 0.0  ;;  %v887_v50 = vadd.f32 %v260_v10, %v253_v40  ;;  %v889_v51 = vadd.f32 %v260_v10, %v251_v41 }
  0x21   : > { %315 = vrot.lane.b32.xlu1 %v291_v36, %s750_s12  ;;  %v287_v52 = vmax.f32 %v880_v44, 0.0  ;;  %v242_v53 = vmul.f32 %v866_v35, %v214_v45  ;;  %v240_v54 = vmul.f32 %v866_v35, %v212_v38  ;;  %v222_v55 = vunpack.c.h.bf16 %v839_v8 }
  0x22   : > { %307 = vrot.lane.b32.xlu0 %v283_v37, %s750_s12  ;;  %v297_v57 = vmax.f32 %v887_v50, 0.0  ;;  %v295_v58 = vmax.f32 %v889_v51, 0.0  ;;  %v248_v59 = vmul.f32 %v866_v35, %v220_v48  ;;  %v218_v60 = vunpack.c.h.bf16 %v842_v13 }
  0x23   : > { %v270_v61 = vadd.f32 %v264_v47, %v242_v53  ;;  %v268_v62 = vadd.f32 %v264_v47, %v240_v54  ;;  %v250_v63 = vmul.f32 %v866_v35, %v222_v55  ;;  %v216_v0 = vunpack.c.h.bf16 %v844_v14 }
  0x24   : > { %v276_v2 = vadd.f32 %v264_v47, %v248_v59  ;;  %v246_v3 = vmul.f32 %v866_v35, %v218_v60  ;;  %v226_v4 = vunpack.c.h.bf16 %v849_v19  ;;  %v224_v5 = vunpack.c.h.bf16 %v851_v20 }
  0x25   : > { %317 = vrot.lane.b32.xlu1 %v293_v42, %s750_s12  ;;  %v286_v6 = vmax.f32 %v270_v61, 0.0  ;;  %v284_v7 = vmax.f32 %v268_v62, 0.0  ;;  %v278_v8 = vadd.f32 %v264_v47, %v250_v63  ;;  %v244_v9 = vmul.f32 %v866_v35, %v216_v0 }
  0x26   : > { %309 = vrot.lane.b32.xlu0 %v285_v43, %s750_s12  ;;  %v254_v10 = vmul.f32 %v866_v35, %v226_v4  ;;  %v252_v11 = vmul.f32 %v866_v35, %v224_v5  ;;  %v292_v13 = vmax.f32 %v276_v2, 0.0  ;;  %v274_v14 = vadd.f32 %v264_v47, %v246_v3 }
  0x27   : > { %v294_v12 = vmax.f32 %v278_v8, 0.0  ;;  %v272_v15 = vadd.f32 %v264_v47, %v244_v9 }
  0x28   : > { %v290_v16 = vmax.f32 %v274_v14, 0.0  ;;  %v282_v18 = vadd.f32 %v264_v47, %v254_v10  ;;  %v280_v19 = vadd.f32 %v264_v47, %v252_v11 }
  0x29   : > { %313 = vrot.lane.b32.xlu1 %v289_v49, %s750_s12  ;;  %v288_v17 = vmax.f32 %v272_v15, 0.0 }
  0x2a   : > { %311 = vrot.lane.b32.xlu0 %v287_v52, %s750_s12  ;;  %v298_v20 = vmax.f32 %v282_v18, 0.0  ;;  %v296_v21 = vmax.f32 %v280_v19, 0.0 }
  0x2d   : > { %321 = vrot.lane.b32.xlu1 %v297_v57, %s750_s12 }
  0x2e   : > { %319 = vrot.lane.b32.xlu0 %v295_v58, %s750_s12 }
  0x31   : > { %357 = vrot.lane.b32.xlu1 %v286_v6, %s750_s12 }
  0x32   : > { %355 = vrot.lane.b32.xlu0 %v284_v7, %s750_s12 }
  0x35   : > { %365 = vrot.lane.b32.xlu1 %v294_v12, %s750_s12 }
  0x36   : > { %363 = vrot.lane.b32.xlu0 %v292_v13, %s750_s12 }
  0x39   : > { %361 = vrot.lane.b32.xlu1 %v290_v16, %s750_s12 }
  0x3a   : > { %359 = vrot.lane.b32.xlu0 %v288_v17, %s750_s12 }
  0x3d   : > { %369 = vrot.lane.b32.xlu1 %v298_v20, %s750_s12 }
  0x3e   : > { %367 = vrot.lane.b32.xlu0 %v296_v21, %s750_s12  ;;  %s690_s12 = sshll.u32 %s751_s11, 4  ;;  %s691_s12 = int_to_ptr.vmem [resolvable:$false] %s690_s12 }
  0x3f   : > { %s692_s13 = scalar_lea.vmem %s691_s12, 2048  ;;  %p693_p0 = scmp.lt.s32.totalorder %s961_s5, %s691_s12 }
  0x40   : > { %p694_p1 = scmp.lt.s32.totalorder %s692_s13, %s686_s10 }
  0x42   : > { %p695_p2 = por %p694_p1, %p693_p0 }
  0x44   : > { %p696_p3 = pnand %p695_p2, %p689_p13 }
  0x93   : > { %v316_v22 = vpop.permute.xlu1 %315 }
  0x94   : > { %v308_v23 = vpop.permute.xlu0 %307  ;;  %v335_v38 = vadd.f32 %v316_v22, %v291_v36 }
  0x95   : > { %v331_v28 = vadd.f32 %v308_v23, %v283_v37 }
  0x97   : > { %v318_v24 = vpop.permute.xlu1 %317  ;;  %v339_v45 = vadd.f32 %v331_v28, %v284_v7 }
  0x98   : > { %v310_v25 = vpop.permute.xlu0 %309  ;;  %v336_v40 = vadd.f32 %v318_v24, %v293_v42 }
  0x99   : > { %v332_v31 = vadd.f32 %v310_v25, %v285_v43  ;;  %v343_v43 = vadd.f32 %v335_v38, %v292_v13 }
  0x9a   : > { %v344_v37 = vadd.f32 %v336_v40, %v294_v12 }
  0x9b   : > { %v314_v26 = vpop.permute.xlu1 %313  ;;  %v340_v41 = vadd.f32 %v332_v31, %v286_v6 }
  0x9c   : > { %v312_v27 = vpop.permute.xlu0 %311  ;;  %v334_v30 = vadd.f32 %v314_v26, %v289_v49 }
  0x9d   : > { %v333_v33 = vadd.f32 %v312_v27, %v287_v52 }
  0x9e   : > { %v342_v55 = vadd.f32 %v334_v30, %v290_v16 }
  0x9f   : > { %v322_v34 = vpop.permute.xlu1 %321  ;;  %v341_v49 = vadd.f32 %v333_v33, %v288_v17 }
  0xa0   : > { %v320_v35 = vpop.permute.xlu0 %319  ;;  %v338_v56 = vadd.f32 %v322_v34, %v297_v57 }
  0xa1   : > { %v337_v39 = vadd.f32 %v320_v35, %v295_v58 }
  0xa2   : > { %v346_v63 = vadd.f32 %v338_v56, %v298_v20 }
  0xa3   : > { %v358_v46 = vpop.permute.xlu1 %357  ;;  %v345_v0 = vadd.f32 %v337_v39, %v296_v21 }
  0xa4   : > { %v356_v47 = vpop.permute.xlu0 %355  ;;  %v380_v48 = vadd.f32 %v358_v46, %v340_v41 }
  0xa5   : > { %v379_v53 = vadd.f32 %v356_v47, %v339_v45 }
  0xa7   : > { %v387_v29 = vpack.c.bf16 %v380_v48, %v379_v53  ;;  %v366_v36 = vpop.permute.xlu1 %365 }
  0xa8   : > { %v364_v54 = vpop.permute.xlu0 %363  ;;  %v384_v32 = vadd.f32 %v366_v36, %v344_v37 }
  0xa9   : > { %v383_v42 = vadd.f32 %v364_v54, %v343_v43  ;;  %624 = vmatprep.mubr.msk.bf16.mxu0 %vm423_vm0, %v387_v29 }
  0xab   : > { %v389_v59 = vpack.c.bf16 %v384_v32, %v383_v42  ;;  %v362_v44 = vpop.permute.xlu1 %361 }
  0xac   : > { %v360_v52 = vpop.permute.xlu0 %359  ;;  %v382_v60 = vadd.f32 %v362_v44, %v342_v55 }
  0xad   : > { %v381_v61 = vadd.f32 %v360_v52, %v341_v49  ;;  %628 = vmatprep.mubr.msk.bf16.mxu1 %vm423_vm0, %v389_v59 }
  0xaf   : > { %v388_v62 = vpack.c.bf16 %v382_v60, %v381_v61  ;;  %v370_v1 = vpop.permute.xlu1 %369 }
  0xb0   : > { %v368_v2 = vpop.permute.xlu0 %367  ;;  %v386_v50 = vadd.f32 %v370_v1, %v346_v63 }
  0xb1   : > { %v385_v57 = vadd.f32 %v368_v2, %v345_v0  ;;  %625 = vmatmul.mubr.msk.bf16.vlgmr.msra.gmra.mrb[0].mxu0 %vm423_vm0, %v388_v62 }
  0xb3   : > { %v390_v51 = vpack.c.bf16 %v386_v50, %v385_v57 }
  0xb5   : > { %629 = vmatmul.mubr.msk.bf16.vlgmr.msra.gmra.mrb[0].mxu1 %vm423_vm0, %v390_v51 }
 0x184   : > { %v626_v58 = vpop.f32.mrb[0].mxu0 }
 0x185   : > { %503 = vst [vmem:[%s193_s30 + $0x10] sm:$0xff] %v626_v58  ;;  %v470_v3 = vpop.f32.mrb[1].mxu0 }
 0x186   : > { %501 = vst [vmem:[%s193_s30] sm:$0xff] %v470_v3  ;;  %v627_v4 = vpop.f32.mrb[2].mxu0 }
 0x187   : > { %504 = vst [vmem:[%s193_s30 + $0x18] sm:$0xff] %v627_v4  ;;  %v473_v5 = vpop.f32.mrb[3].mxu0 }
 0x188   : > { %502 = vst [vmem:[%s193_s30 + $0x8] sm:$0xff] %v473_v5  ;;  %v630_v6 = vpop.f32.mrb[0].mxu1 }
 0x189   : > { %507 = vst [vmem:[%s193_s30 + $0x30] sm:$0xff] %v630_v6  ;;  %v486_v7 = vpop.f32.mrb[1].mxu1 }
 0x18a   : > { %505 = vst [vmem:[%s193_s30 + $0x20] sm:$0xff] %v486_v7  ;;  %v631_v8 = vpop.f32.mrb[2].mxu1 }
 0x18b   : > { %508 = vst [vmem:[%s193_s30 + $0x38] sm:$0xff] %v631_v8  ;;  %v489_v9 = vpop.f32.mrb[3].mxu1 }
 0x18c   : > { %506 = vst [vmem:[%s193_s30 + $0x28] sm:$0xff] %v489_v9 }
 0x18d   : > { %699 = shalt.err (!%p696_p3)
}
 0x18e   : > { %s700_s14 = scalar_lea.hbm %s966_s9, 1024  ;;  %s704_s23 = scalar_lea.hbm %s1013_s4, 2048 }
 0x18f   : > { %p701_p4 = scmp.ne.s32.totalorder %s966_s9, %s700_s14  ;;  %p705_p9 = scmp.lt.u32.totalorder %s966_s9, %s1013_s4 }
 0x190   : > { %p706_p10 = scmp.lt.u32.totalorder %s704_s23, %s700_s14  ;;  %p708_p12 = scmp.lt.u32.totalorder %s700_s14, %s966_s9 }
 0x191   : > { %p702_p7 = pnand %p701_p4, %p817_p5 }
 0x192   : > { %p707_p11 = por %p706_p10, %p705_p9 }
 0x193   : > { %p703_p8 = pneg %p702_p7 }
 0x194   : > { %p709_p13 = por %p708_p12, %p707_p11 }
 0x196   : > { %p710_p0 = pnand %p709_p13, %p703_p8 }
 0x198   : > { %713 = shalt.err (!%p710_p0)
}
 0x199   : > { %s752_s29 = smov 128   ;;  %s753_s30 = smov 8  }
 0x19a   : > { %640 = dma.vmem_to_hbm [thread:$0]  (%p817_p5), %s961_s5, 1024, %s966_s9, %s968_s19, %s752_s29, %s752_s29, %s753_s30  }
 0x19b PF: > { %p646_p1 = scmp.ge.s32.totalorder %s748_s18, 2  ;;  %s538_s6 = sand.u32 1, %s736_s15  }
 0x19c   : > { %s539_s7 = scalar_lea.sflag [#allocation3], %s538_s6 }
 0x19d   : > { %p643_p2 = pnand %p646_p1, %p821_p6 }
 0x19f   : > { %731 = dma.done.wait (!%p643_p2), %s539_s7, 1024  }
 0x1a0   : > { %733 = vsyncadd (!%p643_p2), %s539_s7, 4294966272  ;;  %p14_p3 = scmp.ge.s32.totalorder %s804_s21, 4   ;;  %s1016_s15 = smov %s740_s16 }
 0x1a1   : > { %s1017_s16 = smov %s744_s17  ;;  %s1018_s17 = smov %s815_s24 }
 0x1a2   : > { %s1019_s18 = smov %s804_s21  ;;  %16 = sbr.rel (!%p14_p3) target bundleno = 3 (0x3), region = 71 }
 0x1a9   :  { %544 = vsyncpa [#allocation3], 1 }
 0x1aa   :  { %546 = vsyncpa [#allocation3 + $0x1], 1 }

</bundles_post_ra>
